<compile_context>
chip_gen: v7x
topology: tpu7x:2x2x1
jax: 0.10.0
libtpu: 0.0.40
codegen_flags: <defaults>
</compile_context>

<pallas_src>
import functools

import jax
import jax.numpy as jnp
from jax.experimental import pallas as pl
from jax.experimental.pallas import tpu as pltpu


def nsp_head_kernel(x_ref, w_ref, b_ref, o_ref):
    # x_ref: [TB, H] (VMEM, streamed)   w_ref: [2, H] (VMEM, resident)
    # b_ref: [2]     (SMEM)             o_ref: [TB, 2]
    x = x_ref[...].astype(jnp.float32)            # [TB, H]
    w = w_ref[...].astype(jnp.float32)            # [2, H]

    # Two VPU multiplies + XLU lane reductions (one per output label),
    # accumulated in f32; bias added as SMEM scalars.
    s0 = jnp.sum(x * w[0:1, :], axis=-1, keepdims=True) + b_ref[0]   # [TB, 1]
    s1 = jnp.sum(x * w[1:2, :], axis=-1, keepdims=True) + b_ref[1]   # [TB, 1]

    # Assemble [TB, 2] logits with a pure-VPU select (no lane concatenate).
    col = jax.lax.broadcasted_iota(jnp.int32, o_ref.shape, 1)        # [TB, 2]
    o_ref[...] = jnp.where(col == 0, s0, s1).astype(o_ref.dtype)


def _pick_block_b(batch, hidden, itemsize,
                  vmem_budget_bytes=12 * 1024 * 1024, max_block=1024):
    """Largest batch tile whose double-buffered activation tile fits the budget."""
    fit = max(8, vmem_budget_bytes // (2 * hidden * itemsize))
    tb = min(batch, fit, max_block)
    if tb < batch:
        tb = max(8, (tb // 8) * 8)    # sublane (8) alignment for partial tiling
    return int(tb)


@functools.partial(jax.jit, static_argnames=("block_b",))
def bert_only_nsp_head(pooled_output, weight, bias, *, block_b=None):
    """pooled_output: [B, H], weight: [2, H] (torch layout), bias: [2] -> [B, 2]."""
    B, H = pooled_output.shape
    n_labels = weight.shape[0]
    tb = block_b if block_b is not None else _pick_block_b(
        B, H, pooled_output.dtype.itemsize)
    grid = (pl.cdiv(B, tb),)

    return pl.pallas_call(
        nsp_head_kernel,
        out_shape=jax.ShapeDtypeStruct((B, n_labels), pooled_output.dtype),
        grid_spec=pltpu.PrefetchScalarGridSpec(
            num_scalar_prefetch=0,
            grid=grid,
            in_specs=[
                # Activation: batch-tiled, streamed & double-buffered.
                pl.BlockSpec((tb, H), lambda i: (i, 0)),
                # Weight: whole [2, H], resident across grid steps.
                pl.BlockSpec((n_labels, H), lambda i: (0, 0)),
                # Bias: two scalars in SMEM (no VMEM tile per step).
                pl.BlockSpec(memory_space=pltpu.MemorySpace.SMEM),
            ],
            out_specs=pl.BlockSpec((tb, n_labels), lambda i: (i, 0)),
        ),
        compiler_params=pltpu.CompilerParams(
            # Batch tiles are independent -> megacore sharding on v7x.
            dimension_semantics=("parallel",),
        ),
    )(pooled_output, weight, bias)


if __name__ == "__main__":
    key = jax.random.PRNGKey(0)
    batch, hidden = 8, 32   # small shapes; config.hidden_size = 32

    k_x, k_w, k_b = jax.random.split(key, 3)
    # Deterministic synthetic parameters (nn.Linear(hidden, 2) shapes).
    pooled_output = jax.random.normal(k_x, (batch, hidden), dtype=jnp.float32)
    weight = jax.random.normal(k_w, (2, hidden), dtype=jnp.float32) * 0.02  # torch [out, in]
    bias = jax.random.normal(k_b, (2,), dtype=jnp.float32) * 0.02

    out = bert_only_nsp_head(pooled_output, weight, bias)
    out = jax.block_until_ready(out)

    ref = pooled_output @ weight.T + bias
    assert out.shape == (batch, 2)
    assert jnp.allclose(out, ref, atol=1e-5, rtol=1e-5)

    # Exercise the multi-step, partially-filled-last-tile pipeline path too.
    batch2 = 20
    x2 = jax.random.normal(jax.random.PRNGKey(1), (batch2, hidden), dtype=jnp.float32)
    out2 = jax.block_until_ready(bert_only_nsp_head(x2, weight, bias, block_b=8))
    ref2 = x2 @ weight.T + bias
    assert out2.shape == (batch2, 2)
    assert jnp.allclose(out2, ref2, atol=1e-5, rtol=1e-5)

    print("KERNEL_OK")
</pallas_src>

<mosaic_0001>
module attributes {stable_mosaic.version = 11 : i64} {
  func.func @nsp_head_kernel(%arg0: i32, %arg1: memref<8x32xf32, #tpu.memory_space<vmem>>, %arg2: memref<2x32xf32, #tpu.memory_space<vmem>>, %arg3: memref<2xf32, #tpu.memory_space<smem>>, %arg4: memref<8x2xf32, #tpu.memory_space<vmem>>) attributes {dimension_semantics = [#tpu.dimension_semantics<parallel>], iteration_bounds = array<i64: 1>, scalar_prefetch = 0 : i64, scratch_operands = 0 : i64, tpu.core_type = #tpu.core_type<tc>, window_params = [{transform_indices = @transform_0, window_bounds = array<i64: 8, 32>}, {pipeline_mode = #tpu.pipeline_mode<synchronous>, transform_indices = @transform_1, window_bounds = array<i64: 2, 32>}, {transform_indices = @transform_2, window_bounds = array<i64: 2>}, {transform_indices = @transform_3, window_bounds = array<i64: 8, 2>}]} {
    %c0 = arith.constant 0 : index
    %c0_0 = arith.constant 0 : index
    %0 = vector.load %arg1[%c0, %c0_0] : memref<8x32xf32, #tpu.memory_space<vmem>>, vector<8x32xf32>
    %c0_1 = arith.constant 0 : index
    %c0_2 = arith.constant 0 : index
    %1 = vector.load %arg2[%c0_1, %c0_2] : memref<2x32xf32, #tpu.memory_space<vmem>>, vector<2x32xf32>
    %2 = vector.extract_strided_slice %1 {offsets = [0, 0], sizes = [1, 32], strides = [1, 1]} : vector<2x32xf32> to vector<1x32xf32>
    %3 = vector.broadcast %2 : vector<1x32xf32> to vector<8x32xf32>
    %4 = arith.mulf %0, %3 : vector<8x32xf32>
    %cst = arith.constant dense<0.000000e+00> : vector<8xf32>
    %5 = vector.multi_reduction <add>, %4, %cst [1] : vector<8x32xf32> to vector<8xf32>
    %6 = vector.shape_cast %5 : vector<8xf32> to vector<8x1xf32>
    %c0_3 = arith.constant 0 : index
    %7 = memref.load %arg3[%c0_3] : memref<2xf32, #tpu.memory_space<smem>>
    %8 = vector.broadcast %7 : f32 to vector<8x1xf32>
    %9 = arith.addf %6, %8 : vector<8x1xf32>
    %10 = vector.extract_strided_slice %1 {offsets = [1, 0], sizes = [1, 32], strides = [1, 1]} : vector<2x32xf32> to vector<1x32xf32>
    %11 = vector.broadcast %10 : vector<1x32xf32> to vector<8x32xf32>
    %12 = arith.mulf %0, %11 : vector<8x32xf32>
    %cst_4 = arith.constant dense<0.000000e+00> : vector<8xf32>
    %13 = vector.multi_reduction <add>, %12, %cst_4 [1] : vector<8x32xf32> to vector<8xf32>
    %14 = vector.shape_cast %13 : vector<8xf32> to vector<8x1xf32>
    %c1 = arith.constant 1 : index
    %15 = memref.load %arg3[%c1] : memref<2xf32, #tpu.memory_space<smem>>
    %16 = vector.broadcast %15 : f32 to vector<8x1xf32>
    %17 = arith.addf %14, %16 : vector<8x1xf32>
    %18 = tpu.iota {dimensions = array<i32: 1>} : vector<8x2xi32>
    %c0_i32 = arith.constant 0 : i32
    %19 = vector.broadcast %c0_i32 : i32 to vector<8x2xi32>
    %20 = arith.cmpi eq, %18, %19 : vector<8x2xi32>
    %21 = vector.shape_cast %9 : vector<8x1xf32> to vector<8x1xf32>
    %22 = vector.broadcast %21 : vector<8x1xf32> to vector<8x2xf32>
    %23 = vector.shape_cast %17 : vector<8x1xf32> to vector<8x1xf32>
    %24 = vector.broadcast %23 : vector<8x1xf32> to vector<8x2xf32>
    %25 = arith.select %20, %22, %24 : vector<8x2xi1>, vector<8x2xf32>
    %c0_5 = arith.constant 0 : index
    %c0_6 = arith.constant 0 : index
    %26 = vector.load %arg4[%c0_5, %c0_6] : memref<8x2xf32, #tpu.memory_space<vmem>>, vector<8x2xf32>
    tpu.vector_store %arg4[%c0_5, %c0_6], %25 {strides = array<i32>} : memref<8x2xf32, #tpu.memory_space<vmem>>, vector<8x2xf32>,
    return
  }
  func.func @transform_0(%arg0: i32) -> (i32, i32) {
    %c0_i32 = arith.constant 0 : i32
    %c0_i32_0 = arith.constant 0 : i32
    return %arg0, %c0_i32 : i32, i32
  }
  func.func @transform_1(%arg0: i32) -> (i32, i32) {
    %c0_i32 = arith.constant 0 : i32
    %c0_i32_0 = arith.constant 0 : i32
    %c0_i32_1 = arith.constant 0 : i32
    return %c0_i32, %c0_i32_0 : i32, i32
  }
  func.func @transform_2(%arg0: i32) -> i32 {
    %c0_i32 = arith.constant 0 : i32
    %c0_i32_0 = arith.constant 0 : i32
    return %c0_i32 : i32
  }
  func.func @transform_3(%arg0: i32) -> (i32, i32) {
    %c0_i32 = arith.constant 0 : i32
    %c0_i32_0 = arith.constant 0 : i32
    return %arg0, %c0_i32 : i32, i32
  }
}

</mosaic_0001>

<bundles_post_ra>
// kernel: bert_only_nsp_head.1
= control target key start
LH: loop header
LB: loop body
LE: loop exit
PB: predicated region body
PF: predicated region fallthrough
CT: control target
= control target key end

     0   :  { %8 = vsyncpa [#allocation3], 0  ;;  %s160_s0 = inlined_call_operand.hbm [shape: f32[8,32], index: 0, kind: input, shape index: {}]   ;;  %s161_s1 = inlined_call_operand.vmem [shape: f32[2,32], index: 1, kind: input, shape index: {}]   ;;  %s162_s2 = inlined_call_operand.vmem [shape: f32[2], index: 2, kind: input, shape index: {}]   ;;  %s163_s3 = inlined_call_operand.vmem [shape: f32[8,2], index: 3, kind: output, shape index: {}]  }
   0x1   :  { %9 = vsyncpa [#allocation4], 0  ;;  %s28_s14 = sshll.u32 %s162_s2, 4  ;;  %s117_s15 = smov [#allocation2]   ;;  %s29_s14 = int_to_ptr.vmem [resolvable:$true] %s28_s14 }
   0x2   :  { %s16_s16 = sshll.u32 %s117_s15, 4  ;;  %s79_s19 = scalar_lea.hbm %s160_s0, 128  ;;  %s17_s16 = int_to_ptr.vmem [resolvable:$true] %s16_s16 }
   0x3   :  { %p80_p0 = scmp.ne.s32.totalorder %s160_s0, %s79_s19  ;;  %p83_p1 = scmp.lt.u32.totalorder %s79_s19, %s160_s0 }
   0x5   :  { %p85_p2 = pnand %p83_p1, %p80_p0 }
   0x7   :  { %88 = shalt.err (!%p85_p2)
}
   0x8   :  { %s89_s24 = scalar_lea.vmem %s17_s16, 128  ;;  %p94_p4 = scmp.lt.s32.totalorder %s17_s16, %s17_s16 }
   0x9   :  { %p90_p3 = scmp.ne.s32.totalorder %s17_s16, %s89_s24  ;;  %p95_p5 = scmp.lt.s32.totalorder %s89_s24, %s89_s24 }
   0xb   :  { %p96_p6 = por %p95_p5, %p94_p4 }
   0xd   :  { %p97_p7 = pnand %p96_p6, %p90_p3 }
   0xf   :  { %100 = shalt.err (!%p97_p7)
}
  0x10   :  { %19 = dma.hbm_to_vmem [thread:$0]  %s160_s0, 128, %s17_s16, [#allocation3]  }
  0x11   :  { %s101_s26 = scalar_lea.vmem %s29_s14, 16  ;;  %p106_p9 = scmp.lt.s32.totalorder %s29_s14, %s29_s14 }
  0x12   :  { %p102_p8 = scmp.ne.s32.totalorder %s29_s14, %s101_s26  ;;  %p107_p10 = scmp.lt.s32.totalorder %s101_s26, %s101_s26 }
  0x14   :  { %p108_p11 = por %p107_p10, %p106_p9 }
  0x16   :  { %p109_p12 = pnand %p108_p11, %p102_p8 }
  0x18   :  { %112 = shalt.err (!%p109_p12)
}
  0x19   :  { %s118_s27 = smov [#allocation5]  }
  0x1a   :  { %31 = dma.vmem_to_smem %s29_s14, 16, %s118_s27, [#allocation4]  }
  0x1b   :  { %113 = dma.done.wait [#allocation3], 128  }
  0x1c   :  { %114 = vsyncadd [#allocation3], 4294967168 }
  0x1d   :  { %115 = dma.done.wait [#allocation4], 16  }
  0x1e   :  { %116 = vsyncadd [#allocation4], 4294967280 }
  0x1f   :  { %38 = sfence }
  0x20   :  { %v41_v0 = vlaneseq  ;;  %v40_v2 = vld [vmem:[%s161_s1] sm:$0x3]  ;;  %v39_v5 = vld [vmem:[#allocation2] sm:$0xff]  ;;  %vm46_vm0 = vcmask 261120   ;;  %s50_s0 = sld [smem:[#allocation5]]  ;;  %s76_s30 = sld [smem:[#allocation5 + $0x1]] }
  0x21   :  { %vm68_vm2 = vcmask 15360  }
  0x22   :  { %v42_v1 = vshrl.u32 %v41_v0, 7  ;;  %v65_v13 = vand.u32 127, %v41_v0 }
  0x24   :  { %v43_v3 = vsub.s32 0, %v42_v1  ;;  %v55_v4 = vsub.s32 1, %v42_v1  ;;  %vm66_vm1 = vcmp.eq.s32.totalorder %v65_v13, 0 }
  0x26   :  { %v44_v6 = vrot.slane %v40_v2, %v43_v3  ;;  %v56_v7 = vrot.slane %v40_v2, %v55_v4  ;;  %v51_v14 = vstv %s50_s0  ;;  %v62_v15 = vstv %s76_s30 }
  0x28   :  { %v45_v8 = vmul.f32 %v44_v6, %v39_v5  ;;  %v57_v9 = vmul.f32 %v56_v7, %v39_v5 }
  0x2a   :  { %v47_v10 = vsel %vm46_vm0, %v45_v8, 0.0  ;;  %v58_v11 = vsel %vm46_vm0, %v57_v9, 0.0 }
  0x2b   :  { %48 = vadd.xlane.f32.xlu0 %v47_v10 }
  0x2f   :  { %59 = vadd.xlane.f32.xlu0 %v58_v11 }
  0xb8   :  { %v49_v12 = vpop.xlane.xlu0 %48 }
  0xb9   :  { %v52_v17 = vadd.f32 %v51_v14, %v49_v12 }
  0xbc   :  { %v60_v16 = vpop.xlane.xlu0 %59 }
  0xbd   :  { %v63_v18 = vadd.f32 %v62_v15, %v60_v16 }
  0xbf   :  { %v67_v19 = vsel %vm66_vm1, %v52_v17, %v63_v18 }
  0xc0   :  { %69 = vst.msk [vmem:[%s163_s3] sm:$0xff] %vm68_vm2, %v67_v19 }
  0xc1   :  { %74 = vsyncpa [#allocation3], 1 }
  0xc2   :  { %75 = vsyncpa [#allocation4], 1 }

</bundles_post_ra>
